<compile_context>
chip_gen: v7x
topology: tpu7x:2x2x1
jax: 0.10.0
libtpu: 0.0.40
codegen_flags: <defaults>
</compile_context>

<pallas_src>
import functools
import math

import jax
import jax.numpy as jnp
from jax.experimental import pallas as pl
from jax.experimental.pallas import tpu as pltpu


# --------------------------- sizing helpers -------------------------------- #
def _round_up(v, m):
    return ((v + m - 1) // m) * m


def _round_down_pos(v, m):
    return max(m, (v // m) * m)


def _tpu_vmem_capacity_bytes():
    try:
        return int(pltpu.get_tpu_info().vmem_capacity_bytes)
    except Exception:
        # Conservative fallback (v7x per-core VMEM).
        return 64 << 20


def _vmem_limit_bytes():
    # v5e/v6e (128 MiB physical) -> 64 MiB scoped; v7x (64 MiB) -> 32 MiB.
    cap = _tpu_vmem_capacity_bytes()
    return int(max(32 << 20, min(cap // 2, 64 << 20)))


def _per_block_budget_bytes():
    # 2 double-buffered input blocks + 2 output blocks ~= half the scoped
    # limit, leaving headroom for weights/bias and compiler scratch.
    return _vmem_limit_bytes() // 8


def _sublane_multiple(elem_bytes):
    return {4: 8, 2: 16, 1: 32}.get(elem_bytes, 8)


def _pick_lane_tile(total_lanes, padded_sublanes, elem_bytes, max_tile=8192):
    """Lane tile (multiple of 128) for a (padded_sublanes, tile) block."""
    budget = _per_block_budget_bytes()
    cap = budget // max(1, elem_bytes * padded_sublanes)
    cap = _round_down_pos(cap, 128)
    tile = min(max_tile, cap, _round_up(total_lanes, 128))
    return max(tile, 128)


def _pick_row_tile(total_rows, c, elem_bytes, max_rows=1024):
    """Sublane (row) tile (multiple of 8) for a (tile, C) block."""
    budget = _per_block_budget_bytes()
    cap = budget // max(1, elem_bytes * c)
    cap = _round_down_pos(cap, 8)
    tile = min(max_rows, cap, _round_up(total_rows, 8))
    return max(tile, 8)


# ------------------------------ kernels ------------------------------------ #
def _ln_sublane_kernel(x_ref, w_ref, b_ref, o_ref, *, eps):
    # x_ref: (C, TILE_L); normalize over axis 0 (channels on sublanes).
    x = x_ref[...].astype(jnp.float32)
    u = jnp.mean(x, axis=0, keepdims=True)
    d = x - u
    s = jnp.mean(d * d, axis=0, keepdims=True)          # biased variance
    y = d * jax.lax.rsqrt(s + eps)
    w = w_ref[...].astype(jnp.float32)                   # (C, 1)
    b = b_ref[...].astype(jnp.float32)                   # (C, 1)
    o_ref[...] = (w * y + b).astype(o_ref.dtype)


def _ln_lane_kernel(x_ref, w_ref, b_ref, o_ref, *, eps):
    # x_ref: (TILE_R, C); normalize over last axis (channels on lanes).
    x = x_ref[...].astype(jnp.float32)
    u = jnp.mean(x, axis=-1, keepdims=True)
    d = x - u
    s = jnp.mean(d * d, axis=-1, keepdims=True)
    y = d * jax.lax.rsqrt(s + eps)
    w = w_ref[...].astype(jnp.float32)                   # (1, C)
    b = b_ref[...].astype(jnp.float32)                   # (1, C)
    o_ref[...] = (w * y + b).astype(o_ref.dtype)


# ------------------------------ wrappers ------------------------------------ #
def layer_norm_channels_first(x, weight, bias, eps=1e-6):
    """x: (N, C, H, W), weight/bias: (C,). Normalizes over the channel dim."""
    N, C, H, W = x.shape
    HW = H * W
    x2 = x.reshape(N, C, HW)
    elem_bytes = jnp.dtype(x.dtype).itemsize
    # Account for sublane padding of the (C, tile) block when C is tiny.
    sub_eff = _round_up(C, _sublane_multiple(elem_bytes))
    tile_hw = _pick_lane_tile(HW, sub_eff, elem_bytes)
    hw_pad = _round_up(HW, tile_hw)
    if hw_pad != HW:
        x2 = jnp.pad(x2, ((0, 0), (0, 0), (0, hw_pad - HW)))

    out = pl.pallas_call(
        functools.partial(_ln_sublane_kernel, eps=eps),
        out_shape=jax.ShapeDtypeStruct((N, C, hw_pad), x.dtype),
        grid_spec=pltpu.PrefetchScalarGridSpec(
            num_scalar_prefetch=0,
            grid=(N, hw_pad // tile_hw),
            in_specs=[
                pl.BlockSpec((pl.Squeezed(), C, tile_hw), lambda n, h: (n, 0, h)),
                pl.BlockSpec((C, 1), lambda n, h: (0, 0)),
                pl.BlockSpec((C, 1), lambda n, h: (0, 0)),
            ],
            out_specs=pl.BlockSpec((pl.Squeezed(), C, tile_hw),
                                   lambda n, h: (n, 0, h)),
        ),
        compiler_params=pltpu.CompilerParams(
            dimension_semantics=("parallel", "parallel"),
            vmem_limit_bytes=_vmem_limit_bytes()),
    )(x2, weight.reshape(C, 1), bias.reshape(C, 1))
    if hw_pad != HW:
        out = out[:, :, :HW]
    return out.reshape(N, C, H, W)


def _layer_norm_rows(x2, weight, bias, eps):
    """(R, C) layout, C a multiple of 128 (lane-dense as-is)."""
    R, C = x2.shape
    elem_bytes = jnp.dtype(x2.dtype).itemsize
    tile_r = _pick_row_tile(R, C, elem_bytes)
    r_pad = _round_up(R, tile_r)
    if r_pad != R:
        x2 = jnp.pad(x2, ((0, r_pad - R), (0, 0)))

    out = pl.pallas_call(
        functools.partial(_ln_lane_kernel, eps=eps),
        out_shape=jax.ShapeDtypeStruct((r_pad, C), x2.dtype),
        grid_spec=pltpu.PrefetchScalarGridSpec(
            num_scalar_prefetch=0,
            grid=(r_pad // tile_r,),
            in_specs=[
                pl.BlockSpec((tile_r, C), lambda i: (i, 0)),
                pl.BlockSpec((1, C), lambda i: (0, 0)),
                pl.BlockSpec((1, C), lambda i: (0, 0)),
            ],
            out_specs=pl.BlockSpec((tile_r, C), lambda i: (i, 0)),
        ),
        compiler_params=pltpu.CompilerParams(
            dimension_semantics=("parallel",),
            vmem_limit_bytes=_vmem_limit_bytes()),
    )(x2, weight.reshape(1, C), bias.reshape(1, C))
    return out[:R] if r_pad != R else out


def _layer_norm_cols(xT, weight, bias, eps):
    """(C, R) layout (channels on sublanes): lane-dense for small/unaligned C."""
    C, R = xT.shape
    elem_bytes = jnp.dtype(xT.dtype).itemsize
    sub_eff = _round_up(C, _sublane_multiple(elem_bytes))
    tile_r = _pick_lane_tile(R, sub_eff, elem_bytes)
    r_pad = _round_up(R, tile_r)
    if r_pad != R:
        xT = jnp.pad(xT, ((0, 0), (0, r_pad - R)))

    out = pl.pallas_call(
        functools.partial(_ln_sublane_kernel, eps=eps),
        out_shape=jax.ShapeDtypeStruct((C, r_pad), xT.dtype),
        grid_spec=pltpu.PrefetchScalarGridSpec(
            num_scalar_prefetch=0,
            grid=(r_pad // tile_r,),
            in_specs=[
                pl.BlockSpec((C, tile_r), lambda i: (0, i)),
                pl.BlockSpec((C, 1), lambda i: (0, 0)),
                pl.BlockSpec((C, 1), lambda i: (0, 0)),
            ],
            out_specs=pl.BlockSpec((C, tile_r), lambda i: (0, i)),
        ),
        compiler_params=pltpu.CompilerParams(
            dimension_semantics=("parallel",),
            vmem_limit_bytes=_vmem_limit_bytes()),
    )(xT, weight.reshape(C, 1), bias.reshape(C, 1))
    return out[:, :R] if r_pad != R else out


def layer_norm_channels_last(x, weight, bias, eps=1e-6):
    """x: (..., C), weight/bias: (C,). Normalizes over the last dim."""
    C = x.shape[-1]
    lead = x.shape[:-1]
    R = math.prod(lead) if lead else 1
    x2 = x.reshape(R, C)
    if C % 128 == 0:
        out2 = _layer_norm_rows(x2, weight, bias, eps)
    else:
        # Lane-sparse C: transpose in the wrapper so stores are lane-dense.
        out2 = _layer_norm_cols(x2.T, weight, bias, eps).T
    return out2.reshape(*lead, C)


# ------------------------------ references ---------------------------------- #
def _ref_channels_first(x, w, b, eps):
    x = x.astype(jnp.float32)
    u = jnp.mean(x, axis=1, keepdims=True)
    s = jnp.mean((x - u) ** 2, axis=1, keepdims=True)
    y = (x - u) / jnp.sqrt(s + eps)
    return w[None, :, None, None] * y + b[None, :, None, None]


def _ref_channels_last(x, w, b, eps):
    x = x.astype(jnp.float32)
    u = jnp.mean(x, axis=-1, keepdims=True)
    s = jnp.mean((x - u) ** 2, axis=-1, keepdims=True)
    y = (x - u) / jnp.sqrt(s + eps)
    return w * y + b


# -------------------------------- main --------------------------------------- #
if __name__ == "__main__":
    key = jax.random.PRNGKey(0)
    kx, kw, kb, kx2, kw2, kb2, kx3 = jax.random.split(key, 7)

    eps = 1e-6
    N, C, H, W = 2, 4, 16, 16

    # __init__ uses ones/zeros; perturb deterministically so the affine part
    # is actually exercised.
    weight = jnp.ones((C,), jnp.float32) + 0.1 * jax.random.normal(kw, (C,))
    bias = jnp.zeros((C,), jnp.float32) + 0.1 * jax.random.normal(kb, (C,))

    # channels_first (default PyTorch branch): NCHW input.
    x_cf = jax.random.normal(kx, (N, C, H, W), jnp.float32)
    out_cf = jax.block_until_ready(
        layer_norm_channels_first(x_cf, weight, bias, eps))
    ref_cf = _ref_channels_first(x_cf, weight, bias, eps)
    assert jnp.allclose(out_cf, ref_cf, atol=1e-5, rtol=1e-5)

    # channels_last branch, small / lane-sparse C (uses transposed layout).
    x_cl = jax.random.normal(kx2, (N, H, W, C), jnp.float32)
    out_cl = jax.block_until_ready(
        layer_norm_channels_last(x_cl, weight, bias, eps))
    ref_cl = _ref_channels_last(x_cl, weight, bias, eps)
    assert jnp.allclose(out_cl, ref_cl, atol=1e-5, rtol=1e-5)

    # channels_last branch, lane-aligned C (natural (rows, C) layout).
    C2, S = 128, 8
    weight2 = jnp.ones((C2,), jnp.float32) + 0.1 * jax.random.normal(kw2, (C2,))
    bias2 = jnp.zeros((C2,), jnp.float32) + 0.1 * jax.random.normal(kb2, (C2,))
    x_seq = jax.random.normal(kx3, (N, S, C2), jnp.float32)
    out_seq = jax.block_until_ready(
        layer_norm_channels_last(x_seq, weight2, bias2, eps))
    ref_seq = _ref_channels_last(x_seq, weight2, bias2, eps)
    assert jnp.allclose(out_seq, ref_seq, atol=1e-5, rtol=1e-5)

    print("KERNEL_OK")
</pallas_src>

<mosaic_0001>
module attributes {stable_mosaic.version = 11 : i64} {
  func.func @_ln_sublane_kernel(%arg0: i32, %arg1: i32, %arg2: memref<1x4x256xf32, #tpu.memory_space<vmem>>, %arg3: memref<4x1xf32, #tpu.memory_space<vmem>>, %arg4: memref<4x1xf32, #tpu.memory_space<vmem>>, %arg5: memref<1x4x256xf32, #tpu.memory_space<vmem>>) attributes {dimension_semantics = [#tpu.dimension_semantics<parallel>, #tpu.dimension_semantics<parallel>], iteration_bounds = array<i64: 2, 1>, scalar_prefetch = 0 : i64, scratch_operands = 0 : i64, tpu.core_type = #tpu.core_type<tc>, window_params = [{transform_indices = @transform_0, window_bounds = array<i64: 1, 4, 256>}, {pipeline_mode = #tpu.pipeline_mode<synchronous>, transform_indices = @transform_1, window_bounds = array<i64: 4, 1>}, {pipeline_mode = #tpu.pipeline_mode<synchronous>, transform_indices = @transform_2, window_bounds = array<i64: 4, 1>}, {transform_indices = @transform_3, window_bounds = array<i64: 1, 4, 256>}]} {
    %c0 = arith.constant 0 : index
    %c0_0 = arith.constant 0 : index
    %c0_1 = arith.constant 0 : index
    %0 = vector.load %arg2[%c0, %c0_0, %c0_1] : memref<1x4x256xf32, #tpu.memory_space<vmem>>, vector<1x4x256xf32>
    %1 = vector.shape_cast %0 : vector<1x4x256xf32> to vector<4x256xf32>
    %cst = arith.constant dense<0.000000e+00> : vector<256xf32>
    %2 = vector.multi_reduction <add>, %1, %cst [0] : vector<4x256xf32> to vector<256xf32>
    %3 = vector.shape_cast %2 : vector<256xf32> to vector<1x256xf32>
    %cst_2 = arith.constant 4.000000e+00 : f32
    %4 = vector.broadcast %cst_2 : f32 to vector<1x256xf32>
    %5 = arith.divf %3, %4 : vector<1x256xf32>
    %6 = vector.broadcast %5 : vector<1x256xf32> to vector<4x256xf32>
    %7 = arith.subf %1, %6 : vector<4x256xf32>
    %8 = arith.mulf %7, %7 : vector<4x256xf32>
    %cst_3 = arith.constant dense<0.000000e+00> : vector<256xf32>
    %9 = vector.multi_reduction <add>, %8, %cst_3 [0] : vector<4x256xf32> to vector<256xf32>
    %10 = vector.shape_cast %9 : vector<256xf32> to vector<1x256xf32>
    %cst_4 = arith.constant 4.000000e+00 : f32
    %11 = vector.broadcast %cst_4 : f32 to vector<1x256xf32>
    %12 = arith.divf %10, %11 : vector<1x256xf32>
    %cst_5 = arith.constant 9.99999997E-7 : f32
    %13 = vector.broadcast %cst_5 : f32 to vector<1x256xf32>
    %14 = arith.addf %12, %13 : vector<1x256xf32>
    %15 = math.rsqrt %14 : vector<1x256xf32>
    %16 = vector.broadcast %15 : vector<1x256xf32> to vector<4x256xf32>
    %17 = arith.mulf %7, %16 : vector<4x256xf32>
    %c0_6 = arith.constant 0 : index
    %c0_7 = arith.constant 0 : index
    %18 = vector.load %arg3[%c0_6, %c0_7] : memref<4x1xf32, #tpu.memory_space<vmem>>, vector<4x1xf32>
    %c0_8 = arith.constant 0 : index
    %c0_9 = arith.constant 0 : index
    %19 = vector.load %arg4[%c0_8, %c0_9] : memref<4x1xf32, #tpu.memory_space<vmem>>, vector<4x1xf32>
    %20 = vector.broadcast %18 : vector<4x1xf32> to vector<4x256xf32>
    %21 = arith.mulf %20, %17 : vector<4x256xf32>
    %22 = vector.broadcast %19 : vector<4x1xf32> to vector<4x256xf32>
    %23 = arith.addf %21, %22 : vector<4x256xf32>
    %c0_10 = arith.constant 0 : index
    %c0_11 = arith.constant 0 : index
    %c0_12 = arith.constant 0 : index
    %24 = vector.load %arg5[%c0_10, %c0_11, %c0_12] : memref<1x4x256xf32, #tpu.memory_space<vmem>>, vector<1x4x256xf32>
    %25 = vector.shape_cast %24 : vector<1x4x256xf32> to vector<4x256xf32>
    %26 = vector.shape_cast %23 : vector<4x256xf32> to vector<1x4x256xf32>
    tpu.vector_store %arg5[%c0_10, %c0_11, %c0_12], %26 {strides = array<i32>} : memref<1x4x256xf32, #tpu.memory_space<vmem>>, vector<1x4x256xf32>,
    return
  }
  func.func @transform_0(%arg0: i32, %arg1: i32) -> (i32, i32, i32) {
    %c0_i32 = arith.constant 0 : i32
    %c0_i32_0 = arith.constant 0 : i32
    return %arg0, %c0_i32, %arg1 : i32, i32, i32
  }
  func.func @transform_1(%arg0: i32, %arg1: i32) -> (i32, i32) {
    %c0_i32 = arith.constant 0 : i32
    %c0_i32_0 = arith.constant 0 : i32
    %c0_i32_1 = arith.constant 0 : i32
    return %c0_i32, %c0_i32_0 : i32, i32
  }
  func.func @transform_2(%arg0: i32, %arg1: i32) -> (i32, i32) {
    %c0_i32 = arith.constant 0 : i32
    %c0_i32_0 = arith.constant 0 : i32
    %c0_i32_1 = arith.constant 0 : i32
    return %c0_i32, %c0_i32_0 : i32, i32
  }
  func.func @transform_3(%arg0: i32, %arg1: i32) -> (i32, i32, i32) {
    %c0_i32 = arith.constant 0 : i32
    %c0_i32_0 = arith.constant 0 : i32
    return %arg0, %c0_i32, %arg1 : i32, i32, i32
  }
}

</mosaic_0001>

<bundles_post_ra>
// kernel: tpu_custom_call.1
= control target key start
LH: loop header
LB: loop body
LE: loop exit
PB: predicated region body
PF: predicated region fallthrough
CT: control target
= control target key end

     0   :  { %8 = vsyncpa [#allocation3], 0  ;;  %s797_s0 = inlined_call_operand.hbm [shape: f32[2,4,256], index: 0, kind: input, shape index: {}]   ;;  %s798_s1 = inlined_call_operand.vmem [shape: f32[4,1], index: 1, kind: input, shape index: {}]   ;;  %s799_s2 = inlined_call_operand.vmem [shape: f32[4,1], index: 2, kind: input, shape index: {}]   ;;  %s800_s3 = inlined_call_operand.hbm [shape: f32[2,4,256], index: 3, kind: output, shape index: {}]  }
   0x1   :  { %10 = vsyncpa [#allocation3 + $0x1], 0 }
   0x2   :  { %11 = vsyncpa [#allocation4], 0 }
   0x3   :  { %13 = vsyncpa [#allocation4 + $0x1], 0  ;;  %s611_s12 = smov 0   ;;  %s613_s13 = smov 0  }
   0x4   :  { %s615_s14 = smov 0   ;;  %s617_s15 = smov 0  }
   0x5   :  { %s619_s16 = smov 0   ;;  %s621_s17 = smov 0  }
   0x6 LB: > { %s388_s18 = sadd.s32 4294967295, %s586_s17   ;;  %s389_s19 = sadd.s32 4294967294, %s586_s17   ;;  %s586_s17 = sphi %s621_s17, %s19_s17   ;;  %s582_s16 = sphi %s619_s16, %s816_s16   ;;  %s578_s15 = sphi %s617_s15, %s815_s15   ;;  %s574_s14 = sphi %s615_s14, %s814_s14   ;;  %s570_s13 = sphi %s613_s13, %s813_s13   ;;  %s566_s12 = sphi %s611_s12, %s812_s12  }
   0x7   : > { %s31_s20 = sadd.s32 1, %s582_s16  ;;  %s40_s21 = sadd.s32 1, %s574_s14 }
   0x8   : > { %p33_p0 = scmp.ge.s32.totalorder %s31_s20, 2  ;;  %p47_p1 = scmp.ne.s32.totalorder %s574_s14, %s570_s13 }
   0x9   : > { %p48_p2 = scmp.eq.s32.totalorder %s586_s17, 0  ;;  %p53_p3 = scmp.ne.s32.totalorder %s570_s13, %s566_s12 }
   0xa   : > { %s818_s20 = smov (%p33_p0, %s31_s20), 0  ;;  %p54_p5 = scmp.eq.s32.totalorder %s388_s18, 0 }
   0xb   : > { %p652_p4 = por %p48_p2, %p47_p1  ;;  %s35_s23 = ssub.s32 %s582_s16, %s818_s20 }
   0xc   : > { %p121_p6 = scmp.eq.s32.totalorder %s388_s18, 1  ;;  %p38_p7 = scmp.eq.s32.totalorder %s35_s23, 0 }
   0xd   : > { %p658_p8 = por %p54_p5, %p53_p3  ;;  %p127_p10 = scmp.eq.s32.totalorder %s389_s19, 1 }
   0xe   : > { %p662_p9 = por %p121_p6, %p47_p1  ;;  %p417_p13 = scmp.lt.s32.totalorder %s586_s17, 2 }
   0xf   : > { %s667_s26 = scalar_select %p38_p7, %s574_s14, %s40_s21  }
  0x10   : > { %s804_s25 = scalar_select %p662_p9, 1, 0 }
  0x11   : > { %p669_p11 = por %p127_p10, %p53_p3  ;;  %s153_s28 = sand.u32 1, %s574_s14  }
  0x12   : > { %s392_s29 = sshll.u32 %s153_s28, 3  ;;  %s403_s30 = sshll.u32 %s582_s16, 7 }
  0x13   : > { %s805_s27 = scalar_select %p669_p11, 1, 0 }
  0x14   : > { %s680_s6 = scalar_lea.hbm %s797_s0, %s403_s30  ;;  %s157_s7 = scalar_lea.vmem [#allocation2], %s392_s29 }
  0x15   : > { %s167_s8 = sshll.u32 %s157_s7, 4  ;;  %p686_p0 = pnand %p417_p13, %p652_p4  ;;  %s682_s8 = int_to_ptr.vmem [resolvable:$true] %s167_s8 }
  0x16   : > { %s154_s10 = scalar_lea.sflag [#allocation3], %s153_s28  ;;  %s474_s11 = scalar_lea.hbm %s680_s6, 128 }
  0x17   : > { %p475_p3 = scmp.ne.s32.totalorder %s680_s6, %s474_s11  ;;  %p476_p5 = pneg %p686_p0 }
  0x18   : > { %s479_s21 = scalar_lea.hbm %s797_s0, 256  ;;  %p480_p4 = scmp.lt.u32.totalorder %s680_s6, %s797_s0 }
  0x19   : > { %p477_p6 = pnand %p476_p5, %p475_p3  ;;  %p481_p10 = scmp.lt.u32.totalorder %s479_s21, %s474_s11 }
  0x1a   : > { %p483_p12 = scmp.lt.u32.totalorder %s474_s11, %s680_s6 }
  0x1b   : > { %p478_p7 = pneg %p477_p6  ;;  %p482_p13 = por %p481_p10, %p480_p4 }
  0x1d   : > { %p484_p1 = por %p483_p12, %p482_p13 }
  0x1f   : > { %p485_p2 = pnand %p484_p1, %p478_p7 }
  0x21   : > { %488 = shalt.err (!%p485_p2)
}
  0x22   : > { %s489_s28 = scalar_lea.vmem %s682_s8, 128  ;;  %s588_s29 = smov [#allocation2]  }
  0x23   : > { %p490_p3 = scmp.ne.s32.totalorder %s682_s8, %s489_s28  ;;  %s494_s30 = sshll.u32 %s588_s29, 4  ;;  %s495_s30 = int_to_ptr.vmem [resolvable:$false] %s494_s30 }
  0x24   : > { %s496_s4 = scalar_lea.vmem %s495_s30, 256  ;;  %p497_p9 = scmp.lt.s32.totalorder %s682_s8, %s495_s30 }
  0x25   : > { %p492_p6 = pnand %p490_p3, %p476_p5  ;;  %p498_p4 = scmp.lt.s32.totalorder %s496_s4, %s489_s28 }
  0x27   : > { %p493_p11 = pneg %p492_p6  ;;  %p499_p10 = por %p498_p4, %p497_p9 }
  0x29   : > { %p500_p12 = pnand %p499_p10, %p493_p11 }
  0x2b   : > { %503 = shalt.err (!%p500_p12)
}
  0x2c   : > { %412 = dma.hbm_to_vmem [thread:$0]  (!%p686_p0), %s680_s6, 128, %s682_s8, %s154_s10  }
  0x2d   : > { %p807_p1 = scmp.lt.s32.totalorder %s586_s17, 3  ;;  %p808_p2 = scmp.ge.s32.totalorder %s586_s17, 1 }
  0x2f   : > { %p173_p5 = pnand %p808_p2, %p807_p1 }
  0x30   : > { %s722_s5 = sand.u32 (!%p173_p5), 1, %s570_s13  }
  0x31   : > { %176 = sbr.rel (%p173_p5) target bundleno = 209 (0xd1), region = 32  ;;  %s396_s7 = sshll.u32 (!%p173_p5), %s722_s5, 3 }
  0x32   : > { %s179_s11 = scalar_lea.sflag (!%p173_p5), [#allocation3], %s722_s5  ;;  %s182_s9 = scalar_lea.vmem (!%p173_p5), [#allocation2], %s396_s7 }
  0x38   : > { %557 = dma.done.wait (%p658_p8), %s179_s11, 128  }
  0x39   : > { %559 = vsyncadd (%p658_p8), %s179_s11, 4294967168  ;;  %v589_v0 = vmov 0   ;;  %v263_v1 = vld [vmem:[%s798_s1] sm:$0xf]  ;;  %vm211_vm0 = vcmask 1043456   ;;  %s404_s24 = sshll.u32 %s578_s15, 7 }
  0x3a   : > { %468 = vset.pattern.permute.xlu0 %v589_v0  ;;  %v264_v2 = vld [vmem:[%s799_s2] sm:$0xf]  ;;  %s204_s19 = scalar_lea.vmem [#allocation5], %s396_s7  ;;  %s748_s28 = scalar_lea.hbm %s800_s3, %s404_s24 }
  0x3b   : > { %267 = vperm.xlu0 %468, %v263_v1   ;;  %v207_v3 = vld [vmem:[%s182_s9] sm:$0xff]  ;;  %s304_s21 = sshll.u32 %s204_s19, 4  ;;  %s288_s29 = scalar_lea.sflag [#allocation4], %s722_s5  ;;  %s750_s21 = int_to_ptr.vmem [resolvable:$true] %s304_s21 }
  0x3c   : > { %v209_v4 = vcombine.high %v207_v3, %v207_v3  ;;  %v212_v5 = vsel %vm211_vm0, %v207_v3, 0.0  ;;  %s504_s30 = scalar_lea.vmem %s750_s21, 128  ;;  %p809_p9 = scmp.ne.s32.totalorder %s804_s25, 0 }
  0x3d   : > { %v213_v7 = vrot.slane %v212_v5, 4  ;;  %p505_p8 = scmp.ne.s32.totalorder %s750_s21, %s504_s30  ;;  %s590_s15 = smov [#allocation5]  }
  0x3e   : > { %v219_v6 = vsel %vm211_vm0, %v209_v4, 0.0  ;;  %s508_s4 = sshll.u32 %s590_s15, 4  ;;  %s509_s4 = int_to_ptr.vmem [resolvable:$false] %s508_s4 }
  0x3f   : > { %277 = vperm.xlu0 %468, %v264_v2   ;;  %v220_v8 = vrot.slane %v219_v6, 4  ;;  %v214_v9 = vadd.f32 %v213_v7, %v212_v5  ;;  %p506_p11 = pnand %p505_p8, %p809_p9  ;;  %s510_s7 = scalar_lea.vmem %s509_s4, 256 }
  0x40   : > { %p511_p7 = scmp.lt.s32.totalorder %s750_s21, %s509_s4  ;;  %p512_p13 = scmp.lt.s32.totalorder %s510_s7, %s504_s30 }
  0x41   : > { %v221_v10 = vadd.f32 %v220_v8, %v219_v6  ;;  %v215_v11 = vrot.slane %v214_v9, 2  ;;  %p507_p0 = pneg %p506_p11 }
  0x42   : > { %p513_p3 = por %p512_p13, %p511_p7 }
  0x43   : > { %v222_v12 = vrot.slane %v221_v10, 2  ;;  %v216_v13 = vadd.f32 %v215_v11, %v214_v9 }
  0x44   : > { %p514_p6 = pnand %p513_p3, %p507_p0 }
  0x45   : > { %v223_v14 = vadd.f32 %v222_v12, %v221_v10  ;;  %v217_v15 = vrot.slane %v216_v13, 1 }
  0x47   : > { %v224_v16 = vrot.slane %v223_v14, 1  ;;  %v218_v17 = vadd.f32 %v217_v15, %v216_v13 }
  0x49   : > { %v225_v18 = vadd.f32 %v224_v16, %v223_v14  ;;  %v227_v19 = vmul.f32 0.25, %v218_v17 }
  0x4b   : > { %v228_v20 = vmul.f32 0.25, %v225_v18 }
  0x4d   : > { %v231_v21 = vcombine.low %v227_v19, %v228_v20 }
  0x4f   : > { %v233_v22 = vsub.f32 %v207_v3, %v231_v21 }
  0x51   : > { %v234_v23 = vmul.f32 %v233_v22, %v233_v22 }
  0x53   : > { %v236_v24 = vcombine.high %v234_v23, %v234_v23  ;;  %v238_v25 = vsel %vm211_vm0, %v234_v23, 0.0 }
  0x54   : > { %v239_v27 = vrot.slane %v238_v25, 4 }
  0x55   : > { %v245_v26 = vsel %vm211_vm0, %v236_v24, 0.0 }
  0x56   : > { %v246_v28 = vrot.slane %v245_v26, 4  ;;  %v240_v29 = vadd.f32 %v239_v27, %v238_v25 }
  0x58   : > { %v247_v30 = vadd.f32 %v246_v28, %v245_v26  ;;  %v241_v31 = vrot.slane %v240_v29, 2 }
  0x5a   : > { %v248_v32 = vrot.slane %v247_v30, 2  ;;  %v242_v33 = vadd.f32 %v241_v31, %v240_v29 }
  0x5c   : > { %v249_v34 = vadd.f32 %v248_v32, %v247_v30  ;;  %v243_v35 = vrot.slane %v242_v33, 1 }
  0x5e   : > { %v250_v36 = vrot.slane %v249_v34, 1  ;;  %v244_v37 = vadd.f32 %v243_v35, %v242_v33 }
  0x60   : > { %v251_v38 = vadd.f32 %v250_v36, %v249_v34  ;;  %v252_v39 = vmul.f32 0.25, %v244_v37 }
  0x62   : > { %v253_v40 = vmul.f32 0.25, %v251_v38  ;;  %v254_v41 = vadd.f32 1e-06, %v252_v39 }
  0x64   : > { %v255_v42 = vadd.f32 1e-06, %v253_v40  ;;  %470 = vrsqrt.f32 %v254_v41 }
  0x66   : > { %472 = vrsqrt.f32 %v255_v42 }
  0x6e   : > { %v471_v43 = vpop.eup %470 }
  0x70   : > { %v473_v44 = vpop.eup %472 }
  0x71   : > { %v260_v45 = vcombine.low %v471_v43, %v473_v44 }
  0x73   : > { %v262_v46 = vmul.f32 %v260_v45, %v233_v22 }
  0x75   : > { %v271_v47 = vcombine.high %v262_v46, %v262_v46 }
  0xba   : > { %v268_v48 = vpop.permute.xlu0 %267 }
  0xbb   : > { %v273_v49 = vmul.f32 %v268_v48, %v262_v46  ;;  %v274_v50 = vmul.f32 %v271_v47, %v268_v48 }
  0xbe   : > { %v278_v51 = vpop.permute.xlu0 %277 }
  0xbf   : > { %v280_v52 = vadd.f32 %v278_v51, %v273_v49  ;;  %v281_v53 = vadd.f32 %v278_v51, %v274_v50 }
  0xc1   : > { %v284_v54 = vcombine.low %v280_v52, %v281_v53 }
  0xc3   : > { %286 = vst [vmem:[%s204_s19] sm:$0xff] %v284_v54 }
  0xc4   : > { %517 = shalt.err (!%p514_p6)
}
  0xc5   : > { %s518_s5 = scalar_lea.hbm %s748_s28, 128  ;;  %s522_s6 = scalar_lea.hbm %s800_s3, 256 }
  0xc6   : > { %p519_p4 = scmp.ne.s32.totalorder %s748_s28, %s518_s5  ;;  %p523_p1 = scmp.lt.u32.totalorder %s748_s28, %s800_s3 }
  0xc7   : > { %p524_p2 = scmp.lt.u32.totalorder %s522_s6, %s518_s5  ;;  %p526_p8 = scmp.lt.u32.totalorder %s518_s5, %s748_s28 }
  0xc8   : > { %p520_p10 = pnand %p519_p4, %p809_p9 }
  0xc9   : > { %p525_p5 = por %p524_p2, %p523_p1 }
  0xca   : > { %p521_p12 = pneg %p520_p10 }
  0xcb   : > { %p527_p11 = por %p526_p8, %p525_p5 }
  0xcd   : > { %p528_p0 = pnand %p527_p11, %p521_p12 }
  0xcf   : > { %531 = shalt.err (!%p528_p0)
}
  0xd0   : > { %407 = dma.vmem_to_hbm [thread:$0]  (%p809_p9), %s750_s21, 128, %s748_s28, %s288_s29  }
  0xd1 PF: > { %s316_s18 = sand.u32 1, %s566_s12   ;;  %p810_p7 = scmp.ne.s32.totalorder %s805_s27, 0 }
  0xd2   : > { %p811_p13 = scmp.ge.s32.totalorder %s586_s17, 2  ;;  %s317_s24 = scalar_lea.sflag [#allocation4], %s316_s18 }
  0xd4   : > { %p414_p3 = pnand %p811_p13, %p810_p7 }
  0xd6   : > { %561 = dma.done.wait (!%p414_p3), %s317_s24, 128  }
  0xd7   : > { %563 = vsyncadd (!%p414_p3), %s317_s24, 4294967168  ;;  %s19_s17 = sadd.s32 1, %s586_s17   ;;  %s812_s12 = smov %s570_s13 }
  0xd8   : > { %p16_p6 = scmp.ge.s32.totalorder %s19_s17, 4   ;;  %s813_s13 = smov %s574_s14 }
  0xd9   : > { %s814_s14 = smov %s667_s26  ;;  %s815_s15 = smov %s582_s16 }
  0xda   : > { %s816_s16 = smov %s818_s20  ;;  %18 = sbr.rel (!%p16_p6) target bundleno = 6 (0x6), region = 77 }
  0xe1   :  { %322 = vsyncpa [#allocation3], 1 }
  0xe2   :  { %324 = vsyncpa [#allocation3 + $0x1], 1 }
  0xe3   :  { %325 = vsyncpa [#allocation4], 1 }
  0xe4   :  { %327 = vsyncpa [#allocation4 + $0x1], 1 }

</bundles_post_ra>
